<compile_context>
chip_gen: v7x
topology: tpu7x:2x2x1
jax: 0.10.0
libtpu: 0.0.40
codegen_flags: <defaults>
</compile_context>

<pallas_src>
import functools
import math

import jax
import jax.numpy as jnp
from jax.experimental import pallas as pl
from jax.experimental.pallas import tpu as pltpu

_LANES = 128
_MAX_FOLD_LANES = 1024   # cap on folded row width (benefit vanishes beyond this)


# ---------------------------------------------------------------------------
# device / budget helpers
# ---------------------------------------------------------------------------
def _device_info():
    """Returns (scoped vmem limit bytes, is_v5, is_v7x)."""
    kind = ""
    try:
        kind = jax.devices()[0].device_kind.lower()
    except Exception:
        pass
    phys = None
    try:
        phys = int(pltpu.get_tpu_info().vmem_capacity_bytes)
    except Exception:
        phys = None
    if phys is None:
        phys = (64 << 20) if ("7" in kind) else (128 << 20)
    if phys <= (64 << 20):              # v7x: 64 MiB physical -> ~48 MiB scoped
        limit = phys - (16 << 20)
    else:                               # v5e/v6e: 128 MiB physical -> ~100 MiB
        limit = min(phys - (28 << 20), 100 << 20)
    limit = max(limit, 16 << 20)
    is_v5 = "v5" in kind
    is_v7 = ("v7" in kind) or ("tpu7" in kind.replace(" ", ""))
    return int(limit), is_v5, is_v7


def _pick_chunk(rows, lanes):
    """~64K f32 elements (~256 KiB) per inner chunk, multiple of 8 sublanes."""
    target = max(8, (((64 * 1024) // max(lanes, 1)) // 8) * 8)
    return max(1, min(rows, target))


def _pick_tile_rows(rows, cap):
    """Largest divisor of `rows` <= cap, preferring sublane multiples of 8."""
    cap = max(1, min(rows, cap))
    fallback = 1
    for d in range(cap, 0, -1):
        if rows % d == 0:
            if d % 8 == 0:
                return d
            if fallback == 1:
                fallback = d
    return fallback


# ---------------------------------------------------------------------------
# in-kernel helpers (shared by single-pass and two-phase kernels)
# ---------------------------------------------------------------------------
def _chunked_sumsq(x_ref, rows, lanes, chunk):
    """f32 per-lane sum of squares of a (rows, lanes) ref, chunked over rows."""
    n_full = rows // chunk
    tail = rows - n_full * chunk

    def add_chunk(r0, size, acc):
        blk = x_ref[pl.ds(r0, size), :].astype(jnp.float32)
        return acc + jnp.sum(blk * blk, axis=0, keepdims=True)

    acc = jnp.zeros((1, lanes), jnp.float32)
    if n_full > 0:
        def body(i, a):
            return add_chunk(pl.multiple_of(i * chunk, chunk), chunk, a)
        acc = jax.lax.fori_loop(0, n_full, body, acc, unroll=min(4, n_full))
    if tail > 0:
        acc = add_chunk(n_full * chunk, tail, acc)
    return acc


def _finish_channel_sum(ss, channels, lanes):
    """Lane l holds a partial for channel l % channels; finish with XLU rolls.

    lanes // channels is a power of two by construction, so log-step cyclic
    rotations by multiples of `channels` give every lane its channel's total.
    """
    shift = channels
    while shift < lanes:
        ss = ss + pltpu.roll(ss, shift=shift, axis=1)
        shift *= 2
    return ss


def _scale_bias(ss, gamma, beta, lanes, compute_dtype):
    gx = jnp.sqrt(ss)                                          # (1, lanes) f32
    # each channel appears lanes/C times -> lane mean == channel mean
    mean_gx = jnp.sum(gx, axis=-1, keepdims=True) * (1.0 / lanes)
    nx = gx * pl.reciprocal(mean_gx + 1e-6)                    # exact reciprocal
    scale = (gamma.astype(jnp.float32) * nx + 1.0).astype(compute_dtype)
    bias = beta.astype(compute_dtype)
    return scale, bias


def _apply_scale_bias(x_ref, o_ref, scale, bias, rows, chunk):
    """o = x * scale + bias, chunked; scale/bias already in the compute dtype."""
    n_full = rows // chunk
    tail = rows - n_full * chunk

    def write_chunk(r0, size):
        xb = x_ref[pl.ds(r0, size), :].astype(scale.dtype)
        o_ref[pl.ds(r0, size), :] = (xb * scale + bias).astype(o_ref.dtype)

    if n_full > 0:
        def body(i, carry):
            write_chunk(pl.multiple_of(i * chunk, chunk), chunk)
            return carry
        jax.lax.fori_loop(0, n_full, body, 0, unroll=min(4, n_full))
    if tail > 0:
        write_chunk(n_full * chunk, tail)


# ---------------------------------------------------------------------------
# kernels
# ---------------------------------------------------------------------------
def _grn_single_kernel(x_ref, g_ref, b_ref, o_ref, *, channels, lanes, rows,
                       chunk, compute_dtype):
    """One batch element resident in VMEM: reduce + fused epilogue."""
    ss = _finish_channel_sum(_chunked_sumsq(x_ref, rows, lanes, chunk),
                             channels, lanes)
    scale, bias = _scale_bias(ss, g_ref[...], b_ref[...], lanes, compute_dtype)
    _apply_scale_bias(x_ref, o_ref, scale, bias, rows, chunk)


def _grn_reduce_kernel(x_ref, ss_ref, *, channels, lanes, tile_rows, chunk):
    """Phase 1: per-channel sum of squares with a resident (1, lanes) output."""
    r = pl.program_id(1)

    @pl.when(r == 0)
    def _():
        ss_ref[...] = jnp.zeros_like(ss_ref)

    ss_ref[...] += _chunked_sumsq(x_ref, tile_rows, lanes, chunk)

    @pl.when(r == pl.num_programs(1) - 1)
    def _():
        ss_ref[...] = _finish_channel_sum(ss_ref[...], channels, lanes)


def _grn_apply_kernel(ss_ref, g_ref, b_ref, x_ref, o_ref, *, lanes, tile_rows,
                      chunk, compute_dtype):
    """Phase 2: fused epilogue per row tile (recomputes the tiny scale row)."""
    scale, bias = _scale_bias(ss_ref[...], g_ref[...], b_ref[...], lanes,
                              compute_dtype)
    _apply_scale_bias(x_ref, o_ref, scale, bias, tile_rows, chunk)


# ---------------------------------------------------------------------------
# wrapper
# ---------------------------------------------------------------------------
def global_response_norm(x, gamma, beta, *, force_two_phase=False):
    """x: (B, H, W, C); gamma, beta: (1, 1, 1, C). Returns (B, H, W, C)."""
    B, H, W, C = x.shape
    HW = H * W
    dt = x.dtype
    itemsize = jnp.dtype(dt).itemsize
    vmem_limit, is_v5, is_v7 = _device_info()

    # v5e's VPU has no bf16 ALUs -> f32 epilogue there; f32 inputs stay f32;
    # bf16 stays bf16 on v6e/v7x (2 VALU ops / element).
    compute_dtype = jnp.float32 if (dt == jnp.float32 or is_v5) else dt

    gamma_row = gamma.reshape(1, C)
    beta_row = beta.reshape(1, C)

    # Lane folding: lanes = lcm(C, 128); reps = 128 / gcd(C, 128) is a power of
    # two, so the log-step roll reduction + lane-mean trick hold for any C.
    reps = _LANES // math.gcd(C, _LANES)
    lanes = reps * C
    fold = reps > 1 and (HW % reps == 0) and lanes <= _MAX_FOLD_LANES
    if fold:
        rows = HW // reps
        # TODO(synk): confirm in HLO/xprof that this row-major refold lowers to a
        # bitcast (no HBM relayout copy feeding the pallas custom-call).
        x_in = x.reshape(B, rows, lanes)
        g_in = jnp.tile(gamma_row, (1, reps))          # (1, lanes), lane-dense
        b_in = jnp.tile(beta_row, (1, reps))
    else:
        lanes = C
        rows = HW
        x_in = x.reshape(B, rows, lanes)
        g_in, b_in = gamma_row, beta_row

    chunk = _pick_chunk(rows, lanes)
    # In-kernel f32 temporaries: a few live (chunk, lanes) f32 chunks + row state.
    temps = 6 * chunk * lanes * 4 + (1 << 20)
    # Per-step footprint: double-buffered input + output blocks + temporaries.
    single_step = 4 * rows * lanes * itemsize + temps

    # v7x has 2 TensorCores; with B == 1 a (B,)-grid leaves one idle, so split
    # the batch element spatially (two-phase) to give both cores epilogue work.
    force_split = is_v7 and B == 1 and rows >= 16 and rows % 2 == 0

    single_pass = (single_step <= vmem_limit and not force_split
                   and not force_two_phase)

    if single_pass:
        assert single_step <= vmem_limit
        kernel = functools.partial(
            _grn_single_kernel, channels=C, lanes=lanes, rows=rows,
            chunk=chunk, compute_dtype=compute_dtype)
        out = pl.pallas_call(
            kernel,
            out_shape=jax.ShapeDtypeStruct((B, rows, lanes), dt),
            grid_spec=pltpu.PrefetchScalarGridSpec(
                num_scalar_prefetch=0,
                grid=(B,),
                in_specs=[
                    pl.BlockSpec((None, rows, lanes), lambda b: (b, 0, 0)),
                    pl.BlockSpec((1, lanes), lambda b: (0, 0)),
                    pl.BlockSpec((1, lanes), lambda b: (0, 0)),
                ],
                out_specs=pl.BlockSpec((None, rows, lanes), lambda b: (b, 0, 0)),
            ),
            compiler_params=pltpu.CompilerParams(
                dimension_semantics=("parallel",),
                vmem_limit_bytes=vmem_limit),
        )(x_in, g_in, b_in)
        return out.reshape(B, H, W, C)

    # -------------------- two-phase (row-tiled) fallback --------------------
    max_tile = max(1, (vmem_limit - temps) // (4 * lanes * itemsize))
    if force_split or force_two_phase:
        max_tile = min(max_tile, max(1, rows // 2))   # guarantee >= 2 row tiles
    tile_rows = _pick_tile_rows(rows, max_tile)
    n_tiles = rows // tile_rows
    chunk_t = max(1, min(chunk, tile_rows))
    step_bytes = 4 * tile_rows * lanes * itemsize + temps
    assert step_bytes <= vmem_limit, (
        f"GRN per-step VMEM footprint {step_bytes} B exceeds limit "
        f"{vmem_limit} B (tile_rows={tile_rows}, lanes={lanes})")

    # Phase 1: per-channel sum of squares (batch parallel, row axis arbitrary).
    ss = pl.pallas_call(
        functools.partial(_grn_reduce_kernel, channels=C, lanes=lanes,
                          tile_rows=tile_rows, chunk=chunk_t),
        out_shape=jax.ShapeDtypeStruct((B, 1, lanes), jnp.float32),
        grid_spec=pltpu.PrefetchScalarGridSpec(
            num_scalar_prefetch=0,
            grid=(B, n_tiles),
            in_specs=[
                pl.BlockSpec((None, tile_rows, lanes), lambda b, r: (b, r, 0)),
            ],
            out_specs=pl.BlockSpec((None, 1, lanes), lambda b, r: (b, 0, 0)),
        ),
        compiler_params=pltpu.CompilerParams(
            dimension_semantics=("parallel", "arbitrary"),
            vmem_limit_bytes=vmem_limit),
    )(x_in)

    # Phase 2: fused epilogue; both grid axes parallel (feeds both v7x cores).
    out = pl.pallas_call(
        functools.partial(_grn_apply_kernel, lanes=lanes, tile_rows=tile_rows,
                          chunk=chunk_t, compute_dtype=compute_dtype),
        out_shape=jax.ShapeDtypeStruct((B, rows, lanes), dt),
        grid_spec=pltpu.PrefetchScalarGridSpec(
            num_scalar_prefetch=0,
            grid=(B, n_tiles),
            in_specs=[
                pl.BlockSpec((None, 1, lanes), lambda b, r: (b, 0, 0)),
                pl.BlockSpec((1, lanes), lambda b, r: (0, 0)),
                pl.BlockSpec((1, lanes), lambda b, r: (0, 0)),
                pl.BlockSpec((None, tile_rows, lanes), lambda b, r: (b, r, 0)),
            ],
            out_specs=pl.BlockSpec((None, tile_rows, lanes),
                                   lambda b, r: (b, r, 0)),
        ),
        compiler_params=pltpu.CompilerParams(
            dimension_semantics=("parallel", "parallel"),
            vmem_limit_bytes=vmem_limit),
    )(ss, g_in, b_in, x_in)
    return out.reshape(B, H, W, C)


# ---------------------------------------------------------------------------
# reference + tests
# ---------------------------------------------------------------------------
def _reference(x, gamma, beta):
    x32 = x.astype(jnp.float32)
    gx = jnp.sqrt(jnp.sum(x32 * x32, axis=(1, 2), keepdims=True))
    nx = gx / (jnp.mean(gx, axis=-1, keepdims=True) + 1e-6)
    return (gamma * (x32 * nx) + beta + x32).astype(x.dtype)


if __name__ == "__main__":
    key = jax.random.PRNGKey(0)

    # 1) Folded fast path (C=4 -> lanes=128), f32, single pass.
    B, H, W, C = 2, 16, 16, 4
    kx, kg, kb = jax.random.split(key, 3)
    x = jax.random.normal(kx, (B, H, W, C), dtype=jnp.float32)
    gamma = 0.1 * jax.random.normal(kg, (1, 1, 1, C), dtype=jnp.float32)
    beta = 0.1 * jax.random.normal(kb, (1, 1, 1, C), dtype=jnp.float32)

    out = jax.block_until_ready(global_response_norm(x, gamma, beta))
    ref = _reference(x, gamma, beta)
    assert out.shape == ref.shape and out.dtype == ref.dtype
    assert jnp.allclose(out, ref, atol=1e-5, rtol=1e-5), "folded path mismatch"

    # 2) Module default init (gamma = beta = 0) must return x exactly.
    zeros = jnp.zeros((1, 1, 1, C), dtype=jnp.float32)
    out0 = jax.block_until_ready(global_response_norm(x, zeros, zeros))
    assert jnp.allclose(out0, x, atol=1e-5, rtol=1e-5)

    # 3) Generalized lcm folding (C=96 -> lanes=384, reps=4).
    B2, H2, W2, C2 = 2, 4, 4, 96
    kx2, kg2, kb2 = jax.random.split(jax.random.PRNGKey(1), 3)
    x2 = jax.random.normal(kx2, (B2, H2, W2, C2), dtype=jnp.float32)
    gamma2 = 0.1 * jax.random.normal(kg2, (1, 1, 1, C2), dtype=jnp.float32)
    beta2 = 0.1 * jax.random.normal(kb2, (1, 1, 1, C2), dtype=jnp.float32)
    out2 = jax.block_until_ready(global_response_norm(x2, gamma2, beta2))
    ref2 = _reference(x2, gamma2, beta2)
    assert jnp.allclose(out2, ref2, atol=1e-5, rtol=1e-5), "lcm-fold mismatch"

    # 4) Two-phase (row-tiled) fallback path, forced on a small shape.
    B3, H3, W3, C3 = 2, 32, 32, 4
    kx3, kg3, kb3 = jax.random.split(jax.random.PRNGKey(2), 3)
    x3 = jax.random.normal(kx3, (B3, H3, W3, C3), dtype=jnp.float32)
    gamma3 = 0.1 * jax.random.normal(kg3, (1, 1, 1, C3), dtype=jnp.float32)
    beta3 = 0.1 * jax.random.normal(kb3, (1, 1, 1, C3), dtype=jnp.float32)
    out3 = jax.block_until_ready(
        global_response_norm(x3, gamma3, beta3, force_two_phase=True))
    ref3 = _reference(x3, gamma3, beta3)
    assert jnp.allclose(out3, ref3, atol=1e-5, rtol=1e-5), "two-phase mismatch"

    # 5) bf16 input (exercises the low-precision epilogue on v6e/v7x).
    xb16 = x.astype(jnp.bfloat16)
    outb = jax.block_until_ready(global_response_norm(xb16, gamma, beta))
    refb = _reference(xb16, gamma, beta)
    assert outb.dtype == jnp.bfloat16
    assert jnp.allclose(outb.astype(jnp.float32), refb.astype(jnp.float32),
                        atol=1e-1, rtol=5e-2), "bf16 path mismatch"

    print("KERNEL_OK")
</pallas_src>

<mosaic_0001>
module attributes {stable_mosaic.version = 11 : i64} {
  func.func @_grn_single_kernel(%arg0: i32, %arg1: memref<1x8x128xf32, #tpu.memory_space<vmem>>, %arg2: memref<1x128xf32, #tpu.memory_space<vmem>>, %arg3: memref<1x128xf32, #tpu.memory_space<vmem>>, %arg4: memref<1x8x128xf32, #tpu.memory_space<vmem>>) attributes {dimension_semantics = [#tpu.dimension_semantics<parallel>], iteration_bounds = array<i64: 2>, scalar_prefetch = 0 : i64, scratch_operands = 0 : i64, tpu.core_type = #tpu.core_type<tc>, window_params = [{transform_indices = @transform_0, window_bounds = array<i64: 1, 8, 128>}, {pipeline_mode = #tpu.pipeline_mode<synchronous>, transform_indices = @transform_1, window_bounds = array<i64: 1, 128>}, {pipeline_mode = #tpu.pipeline_mode<synchronous>, transform_indices = @transform_2, window_bounds = array<i64: 1, 128>}, {transform_indices = @transform_3, window_bounds = array<i64: 1, 8, 128>}]} {
    %cst = arith.constant 0.000000e+00 : f32
    %0 = vector.broadcast %cst : f32 to vector<1x128xf32>
    %c0_i32 = arith.constant 0 : i32
    %c8_i32 = arith.constant 8 : i32
    %1 = arith.muli %c0_i32, %c8_i32 : i32
    %2 = tpu.assume_multiple %1, 8 : i32
    %c0 = arith.constant 0 : index
    %3 = arith.index_cast %2 : i32 to index
    %c0_0 = arith.constant 0 : index
    %4 = vector.load %arg1[%c0, %3, %c0_0] : memref<1x8x128xf32, #tpu.memory_space<vmem>>, vector<1x8x128xf32>
    %5 = vector.shape_cast %4 : vector<1x8x128xf32> to vector<8x128xf32>
    %6 = arith.mulf %5, %5 : vector<8x128xf32>
    %cst_1 = arith.constant dense<0.000000e+00> : vector<128xf32>
    %7 = vector.multi_reduction <add>, %6, %cst_1 [0] : vector<8x128xf32> to vector<128xf32>
    %8 = vector.shape_cast %7 : vector<128xf32> to vector<1x128xf32>
    %9 = arith.addf %0, %8 : vector<1x128xf32>
    %c1_i32 = arith.constant 1 : i32
    %c4_i32 = arith.constant 4 : i32
    %10 = tpu.dynamic_rotate %9 by %c4_i32 dim 1 : vector<1x128xf32>, i32 -> vector<1x128xf32>
    %11 = arith.addf %9, %10 : vector<1x128xf32>
    %c8_i32_2 = arith.constant 8 : i32
    %12 = tpu.dynamic_rotate %11 by %c8_i32_2 dim 1 : vector<1x128xf32>, i32 -> vector<1x128xf32>
    %13 = arith.addf %11, %12 : vector<1x128xf32>
    %c16_i32 = arith.constant 16 : i32
    %14 = tpu.dynamic_rotate %13 by %c16_i32 dim 1 : vector<1x128xf32>, i32 -> vector<1x128xf32>
    %15 = arith.addf %13, %14 : vector<1x128xf32>
    %c32_i32 = arith.constant 32 : i32
    %16 = tpu.dynamic_rotate %15 by %c32_i32 dim 1 : vector<1x128xf32>, i32 -> vector<1x128xf32>
    %17 = arith.addf %15, %16 : vector<1x128xf32>
    %c64_i32 = arith.constant 64 : i32
    %18 = tpu.dynamic_rotate %17 by %c64_i32 dim 1 : vector<1x128xf32>, i32 -> vector<1x128xf32>
    %19 = arith.addf %17, %18 : vector<1x128xf32>
    %c0_3 = arith.constant 0 : index
    %c0_4 = arith.constant 0 : index
    %20 = vector.load %arg2[%c0_3, %c0_4] : memref<1x128xf32, #tpu.memory_space<vmem>>, vector<1x128xf32>
    %c0_5 = arith.constant 0 : index
    %c0_6 = arith.constant 0 : index
    %21 = vector.load %arg3[%c0_5, %c0_6] : memref<1x128xf32, #tpu.memory_space<vmem>>, vector<1x128xf32>
    %22 = math.sqrt %19 : vector<1x128xf32>
    %cst_7 = arith.constant dense<0.000000e+00> : vector<1xf32>
    %23 = vector.multi_reduction <add>, %22, %cst_7 [1] : vector<1x128xf32> to vector<1xf32>
    %24 = vector.shape_cast %23 : vector<1xf32> to vector<1x1xf32>
    %cst_8 = arith.constant 7.812500e-03 : f32
    %25 = vector.broadcast %cst_8 : f32 to vector<1x1xf32>
    %26 = arith.mulf %24, %25 : vector<1x1xf32>
    %cst_9 = arith.constant 9.99999997E-7 : f32
    %27 = vector.broadcast %cst_9 : f32 to vector<1x1xf32>
    %28 = arith.addf %26, %27 : vector<1x1xf32>
    %29 = tpu.reciprocal %28 : vector<1x1xf32> -> vector<1x1xf32>
    %30 = vector.broadcast %29 : vector<1x1xf32> to vector<1x128xf32>
    %31 = arith.mulf %22, %30 : vector<1x128xf32>
    %32 = arith.mulf %20, %31 : vector<1x128xf32>
    %cst_10 = arith.constant 1.000000e+00 : f32
    %33 = vector.broadcast %cst_10 : f32 to vector<1x128xf32>
    %34 = arith.addf %32, %33 : vector<1x128xf32>
    %c0_i32_11 = arith.constant 0 : i32
    %c8_i32_12 = arith.constant 8 : i32
    %35 = arith.muli %c0_i32_11, %c8_i32_12 : i32
    %36 = tpu.assume_multiple %35, 8 : i32
    %c0_13 = arith.constant 0 : index
    %37 = arith.index_cast %36 : i32 to index
    %c0_14 = arith.constant 0 : index
    %38 = vector.load %arg1[%c0_13, %37, %c0_14] : memref<1x8x128xf32, #tpu.memory_space<vmem>>, vector<1x8x128xf32>
    %39 = vector.shape_cast %38 : vector<1x8x128xf32> to vector<8x128xf32>
    %40 = vector.broadcast %34 : vector<1x128xf32> to vector<8x128xf32>
    %41 = arith.mulf %39, %40 : vector<8x128xf32>
    %42 = vector.broadcast %21 : vector<1x128xf32> to vector<8x128xf32>
    %43 = arith.addf %41, %42 : vector<8x128xf32>
    %c0_15 = arith.constant 0 : index
    %44 = arith.index_cast %36 : i32 to index
    %c0_16 = arith.constant 0 : index
    %45 = vector.load %arg4[%c0_15, %44, %c0_16] : memref<1x8x128xf32, #tpu.memory_space<vmem>>, vector<1x8x128xf32>
    %46 = vector.shape_cast %45 : vector<1x8x128xf32> to vector<8x128xf32>
    %47 = vector.shape_cast %43 : vector<8x128xf32> to vector<1x8x128xf32>
    tpu.vector_store %arg4[%c0_15, %44, %c0_16], %47 {strides = array<i32>} : memref<1x8x128xf32, #tpu.memory_space<vmem>>, vector<1x8x128xf32>,
    %c1_i32_17 = arith.constant 1 : i32
    return
  }
  func.func @transform_0(%arg0: i32) -> (i32, i32, i32) {
    %c0_i32 = arith.constant 0 : i32
    %c0_i32_0 = arith.constant 0 : i32
    %c0_i32_1 = arith.constant 0 : i32
    return %arg0, %c0_i32, %c0_i32_0 : i32, i32, i32
  }
  func.func @transform_1(%arg0: i32) -> (i32, i32) {
    %c0_i32 = arith.constant 0 : i32
    %c0_i32_0 = arith.constant 0 : i32
    %c0_i32_1 = arith.constant 0 : i32
    return %c0_i32, %c0_i32_0 : i32, i32
  }
  func.func @transform_2(%arg0: i32) -> (i32, i32) {
    %c0_i32 = arith.constant 0 : i32
    %c0_i32_0 = arith.constant 0 : i32
    %c0_i32_1 = arith.constant 0 : i32
    return %c0_i32, %c0_i32_0 : i32, i32
  }
  func.func @transform_3(%arg0: i32) -> (i32, i32, i32) {
    %c0_i32 = arith.constant 0 : i32
    %c0_i32_0 = arith.constant 0 : i32
    %c0_i32_1 = arith.constant 0 : i32
    return %arg0, %c0_i32, %c0_i32_0 : i32, i32, i32
  }
}

</mosaic_0001>

<bundles_post_ra>
// kernel: tpu_custom_call.1
= control target key start
LH: loop header
LB: loop body
LE: loop exit
PB: predicated region body
PF: predicated region fallthrough
CT: control target
= control target key end

     0   :  { %8 = vsyncpa [#allocation3], 0  ;;  %s882_s0 = inlined_call_operand.hbm [shape: f32[2,8,128], index: 0, kind: input, shape index: {}]   ;;  %s883_s1 = inlined_call_operand.hbm [shape: f32[1,128], index: 1, kind: input, shape index: {}]   ;;  %s884_s2 = inlined_call_operand.hbm [shape: f32[1,128], index: 2, kind: input, shape index: {}]   ;;  %s885_s3 = inlined_call_operand.hbm [shape: f32[2,8,128], index: 3, kind: output, shape index: {}]  }
   0x1   :  { %10 = vsyncpa [#allocation3 + $0x1], 0 }
   0x2   :  { %11 = vsyncpa [#allocation6], 0 }
   0x3   :  { %12 = vsyncpa [#allocation4], 0 }
   0x4   :  { %14 = vsyncpa [#allocation4 + $0x1], 0  ;;  %s652_s12 = smov 0   ;;  %s654_s13 = smov 0  }
   0x5   :  { %s656_s14 = smov 0   ;;  %s658_s15 = smov 0  }
   0x6 LB: > { %s673_s16 = sadd.s32 4294967295, %s621_s15   ;;  %s372_s17 = sadd.s32 4294967294, %s621_s15   ;;  %s621_s15 = sphi %s658_s15, %s905_s15   ;;  %s617_s14 = sphi %s656_s14, %s904_s14   ;;  %s613_s13 = sphi %s654_s13, %s903_s13   ;;  %s609_s12 = sphi %s652_s12, %s902_s12  }
   0x7   : > { %p40_p0 = scmp.ne.s32.totalorder %s613_s13, %s609_s12  ;;  %p886_p1 = scmp.eq.s32.totalorder %s673_s16, 0 }
   0x8   : > { %p112_p3 = scmp.eq.s32.totalorder %s372_s17, 1  ;;  %p373_p5 = scmp.ge.s32.totalorder %s621_s15, 1 }
   0x9   : > { %p682_p4 = por %p886_p1, %p40_p0  ;;  %p119_p7 = scmp.lt.s32.totalorder %s621_s15, 3 }
   0xa   : > { %p687_p6 = por %p112_p3, %p40_p0  ;;  %s623_s21 = smov [#allocation5]  }
   0xb   : > { %s889_s18 = scalar_select %p682_p4, 1, 0 }
   0xc   : > { %s890_s19 = scalar_select %p687_p6, 1, 0 }
   0xd   : > { %p692_p8 = pnand %p373_p5, %p119_p7  ;;  %s132_s22 = sshll.u32 %s623_s21, 4  ;;  %s133_s22 = int_to_ptr.vmem [resolvable:$true] %s132_s22 }
   0xe   : > { %s624_s23 = smov [#allocation7]   ;;  %s708_s26 = sadd.s32 1, %s621_s15  }
   0xf   : > { %s891_s20 = scalar_select %p692_p8, 1, 0 }
  0x10   : > { %p401_p10 = pneg %p692_p8  ;;  %s143_s24 = sshll.u32 %s624_s23, 4  ;;  %s705_s24 = int_to_ptr.vmem [resolvable:$true] %s143_s24 }
  0x11   : > { %s24_s27 = ssub.s32 %s621_s15, %s708_s26  ;;  %s465_s30 = scalar_lea.hbm %s883_s1, 16 }
  0x12   : > { %p701_p11 = pnand %p401_p10, %p886_p1  ;;  %p466_p12 = scmp.ne.s32.totalorder %s883_s1, %s465_s30 }
  0x13   : > { %p472_p5 = scmp.lt.u32.totalorder %s465_s30, %s883_s1 }
  0x14   : > { %p467_p13 = pneg %p701_p11 }
  0x16   : > { %p468_p0 = pnand %p467_p13, %p466_p12 }
  0x18   : > { %p469_p3 = pneg %p468_p0 }
  0x1a   : > { %p474_p7 = pnand %p472_p5, %p469_p3 }
  0x1c   : > { %477 = shalt.err (!%p474_p7)
}
  0x1d   : > { %s478_s8 = scalar_lea.vmem %s133_s22, 16  ;;  %s485_s9 = scalar_lea.vmem %s133_s22, 32 }
  0x1e   : > { %p479_p10 = scmp.ne.s32.totalorder %s133_s22, %s478_s8  ;;  %p486_p2 = scmp.lt.s32.totalorder %s133_s22, %s133_s22 }
  0x1f   : > { %p487_p6 = scmp.lt.s32.totalorder %s485_s9, %s478_s8 }
  0x20   : > { %p481_p9 = pnand %p479_p10, %p467_p13 }
  0x21   : > { %p488_p4 = por %p487_p6, %p486_p2 }
  0x22   : > { %p482_p1 = pneg %p481_p9 }
  0x24   : > { %p489_p8 = pnand %p488_p4, %p482_p1 }
  0x26   : > { %492 = shalt.err (!%p489_p8)
}
  0x27   : > { %404 = dma.hbm_to_vmem [thread:$0]  (!%p701_p11), %s883_s1, 16, %s133_s22, [#allocation6]  }
  0x28   : > { %s493_s23 = scalar_lea.hbm %s884_s2, 16 }
  0x29   : > { %p494_p9 = scmp.ne.s32.totalorder %s884_s2, %s493_s23  ;;  %p500_p4 = scmp.lt.u32.totalorder %s493_s23, %s884_s2 }
  0x2b   : > { %p496_p2 = pnand %p494_p9, %p467_p13 }
  0x2d   : > { %p497_p1 = pneg %p496_p2 }
  0x2f   : > { %p502_p6 = pnand %p500_p4, %p497_p1 }
  0x31   : > { %505 = shalt.err (!%p502_p6)
}
  0x32   : > { %s506_s22 = scalar_lea.vmem %s705_s24, 16  ;;  %s513_s5 = scalar_lea.vmem %s705_s24, 32 }
  0x33   : > { %p507_p8 = scmp.ne.s32.totalorder %s705_s24, %s506_s22  ;;  %p514_p3 = scmp.lt.s32.totalorder %s705_s24, %s705_s24 }
  0x34   : > { %p515_p5 = scmp.lt.s32.totalorder %s513_s5, %s506_s22 }
  0x35   : > { %p509_p12 = pnand %p507_p8, %p467_p13 }
  0x36   : > { %p516_p7 = por %p515_p5, %p514_p3 }
  0x37   : > { %p510_p0 = pneg %p509_p12 }
  0x39   : > { %p517_p10 = pnand %p516_p7, %p510_p0 }
  0x3b   : > { %520 = shalt.err (!%p517_p10)
}
  0x3c   : > { %407 = dma.hbm_to_vmem [thread:$0]  (!%p701_p11), %s884_s2, 16, %s705_s24, [#allocation6]  }
  0x3d   : > { %p25_p13 = scmp.eq.s32.totalorder %s24_s27, 0  ;;  %s27_s8 = sadd.s32 1, %s617_s14 }
  0x3e   : > { %p34_p9 = scmp.ne.s32.totalorder %s617_s14, %s613_s13  ;;  %p35_p2 = scmp.eq.s32.totalorder %s621_s15, 0 }
  0x3f   : > { %s768_s25 = scalar_select %p25_p13, %s617_s14, %s27_s8  }
  0x40   : > { %p36_p1 = por %p35_p2, %p34_p9  ;;  %p893_p4 = scmp.eq.s32.totalorder %s673_s16, 1 }
  0x41   : > { %p418_p8 = scmp.lt.s32.totalorder %s621_s15, 2  ;;  %s154_s10 = sand.u32 1, %s617_s14  }
  0x42   : > { %p772_p6 = por %p893_p4, %p34_p9  ;;  %s377_s11 = sshll.u32 %s154_s10, 3 }
  0x43   : > { %s378_s17 = sshll.u32 %s621_s15, 7  ;;  %s158_s27 = scalar_lea.vmem [#allocation2], %s377_s11 }
  0x44   : > { %s782_s24 = scalar_lea.hbm %s882_s0, %s378_s17  ;;  %s165_s28 = sshll.u32 %s158_s27, 4  ;;  %s784_s28 = int_to_ptr.vmem [resolvable:$true] %s165_s28 }
  0x45   : > { %p786_p11 = pnand %p418_p8, %p36_p1  ;;  %s155_s30 = scalar_lea.sflag [#allocation3], %s154_s10 }
  0x46   : > { %s521_s4 = scalar_lea.hbm %s782_s24, 128  ;;  %s526_s6 = scalar_lea.hbm %s882_s0, 256 }
  0x47   : > { %p522_p12 = scmp.ne.s32.totalorder %s782_s24, %s521_s4  ;;  %p523_p0 = pneg %p786_p11 }
  0x48   : > { %p527_p7 = scmp.lt.u32.totalorder %s782_s24, %s882_s0  ;;  %p528_p10 = scmp.lt.u32.totalorder %s526_s6, %s521_s4 }
  0x49   : > { %p524_p3 = pnand %p523_p0, %p522_p12  ;;  %p530_p9 = scmp.lt.u32.totalorder %s521_s4, %s782_s24 }
  0x4a   : > { %p529_p13 = por %p528_p10, %p527_p7 }
  0x4b   : > { %p525_p5 = pneg %p524_p3 }
  0x4c   : > { %p531_p2 = por %p530_p9, %p529_p13 }
  0x4e   : > { %p532_p1 = pnand %p531_p2, %p525_p5 }
  0x50   : > { %535 = shalt.err (!%p532_p1)
}
  0x51   : > { %s536_s10 = scalar_lea.vmem %s784_s28, 128  ;;  %s625_s11 = smov [#allocation2]  }
  0x52   : > { %p537_p4 = scmp.ne.s32.totalorder %s784_s28, %s536_s10  ;;  %s541_s17 = sshll.u32 %s625_s11, 4  ;;  %s542_s17 = int_to_ptr.vmem [resolvable:$false] %s541_s17 }
  0x53   : > { %s543_s21 = scalar_lea.vmem %s542_s17, 256  ;;  %p544_p3 = scmp.lt.s32.totalorder %s784_s28, %s542_s17 }
  0x54   : > { %p539_p8 = pnand %p537_p4, %p523_p0  ;;  %p545_p7 = scmp.lt.s32.totalorder %s543_s21, %s536_s10 }
  0x56   : > { %p540_p12 = pneg %p539_p8  ;;  %p546_p10 = por %p545_p7, %p544_p3 }
  0x58   : > { %p547_p13 = pnand %p546_p10, %p540_p12 }
  0x5a   : > { %550 = shalt.err (!%p547_p13)
}
  0x5b   : > { %411 = dma.hbm_to_vmem [thread:$0]  (!%p786_p11), %s782_s24, 128, %s784_s28, %s155_s30  }
  0x5c   : > { %p896_p5 = scmp.ne.s32.totalorder %s891_s20, 0 }
  0x5d   : > { %s818_s23 = sand.u32 (!%p896_p5), 1, %s613_s13   ;;  %p897_p0 = scmp.ne.s32.totalorder (!%p896_p5), %s889_s18, 0 }
  0x5e   : > { %174 = sbr.rel (%p896_p5) target bundleno = 904 (0x388), region = 32  ;;  %s380_s27 = sshll.u32 (!%p896_p5), %s818_s23, 3 }
  0x5f   : > { %s177_s4 = scalar_lea.sflag (!%p896_p5), [#allocation3], %s818_s23  ;;  %s180_s22 = scalar_lea.vmem (!%p896_p5), [#allocation2], %s380_s27 }
  0x65   : > { %596 = dma.done.wait (%p897_p0), %s177_s4, 128  }
  0x66   : > { %598 = vsyncadd (%p897_p0), %s177_s4, 4294967168  ;;  %p898_p11 = scmp.eq.s32.totalorder %s673_s16, 0 }
  0x68   : > { %600 = dma.done.wait (%p898_p11), [#allocation6], 32   ;;  %p899_p9 = pmov %p898_p11 }
  0x69   : > { %v211_v0 = vld [vmem:[%s180_s22] sm:$0xff]  ;;  %s626_s20 = smov 4   ;;  %s627_s18 = smov 8   ;;  %vm244_vm1 = vcmask 1040384   ;;  %v255_v27 = vlaneseq  ;;  %v235_v30 = vld [vmem:[#allocation5] sm:$0x1] }
  0x6a   : > { %602 = vsyncadd (%p899_p9), [#allocation6], 4294967264  ;;  %v212_v1 = vmul.f32 %v211_v0, %v211_v0  ;;  %s628_s24 = smov 16   ;;  %s629_s28 = smov 32   ;;  %v384_v36 = vld [vmem:[#allocation7] ss:$0 sm:$0xff] }
  0x6b   : > { %s630_s29 = smov 64   ;;  %v256_v28 = vshrl.u32 %v255_v27, 7  ;;  %s386_s30 = sshll.u32 %s673_s16, 7 }
  0x6c   : > { %v213_v2 = vrot.slane %v212_v1, 4  ;;  %s210_s5 = scalar_lea.vmem [#allocation8], %s380_s27  ;;  %s838_s10 = scalar_lea.hbm %s885_s3, %s386_s30 }
  0x6d   : > { %v257_v33 = vsub.s32 0, %v256_v28  ;;  %s283_s6 = sshll.u32 %s210_s5, 4  ;;  %s270_s11 = scalar_lea.sflag [#allocation4], %s818_s23  ;;  %s840_s6 = int_to_ptr.vmem [resolvable:$true] %s283_s6 }
  0x6e   : > { %v214_v3 = vadd.f32 %v213_v2, %v212_v1  ;;  %s551_s17 = scalar_lea.vmem %s840_s6, 128  ;;  %s631_s16 = smov [#allocation8]  }
  0x6f   : > { %p552_p2 = scmp.ne.s32.totalorder %s840_s6, %s551_s17  ;;  %s555_s21 = sshll.u32 %s631_s16, 4  ;;  %s556_s21 = int_to_ptr.vmem [resolvable:$false] %s555_s21 }
  0x70   : > { %v215_v4 = vrot.slane %v214_v3, 2  ;;  %s557_s27 = scalar_lea.vmem %s556_s21, 256  ;;  %p558_p8 = scmp.lt.s32.totalorder %s840_s6, %s556_s21 }
  0x71   : > { %p553_p1 = pnand %p552_p2, %p772_p6  ;;  %p559_p12 = scmp.lt.s32.totalorder %s557_s27, %s551_s17 }
  0x72   : > { %v216_v5 = vadd.f32 %v215_v4, %v214_v3 }
  0x73   : > { %p554_p4 = pneg %p553_p1  ;;  %p560_p3 = por %p559_p12, %p558_p8 }
  0x74   : > { %v217_v6 = vrot.slane %v216_v5, 1 }
  0x75   : > { %p561_p7 = pnand %p560_p3, %p554_p4 }
  0x76   : > { %v218_v7 = vadd.f32 %v217_v6, %v216_v5 }
  0x78   : > { %220 = vrot.lane.b32.xlu0 %v218_v7, %s626_s20 }
  0xea   : > { %v221_v8 = vpop.permute.xlu0 %220 }
  0xeb   : > { %v222_v9 = vadd.f32 %v221_v8, %v218_v7 }
  0xed   : > { %223 = vrot.lane.b32.xlu0 %v222_v9, %s627_s18 }
 0x15f   : > { %v224_v10 = vpop.permute.xlu0 %223 }
 0x160   : > { %v225_v11 = vadd.f32 %v224_v10, %v222_v9 }
 0x162   : > { %226 = vrot.lane.b32.xlu1 %v225_v11, %s628_s24 }
 0x1d4   : > { %v227_v12 = vpop.permute.xlu1 %226 }
 0x1d5   : > { %v228_v13 = vadd.f32 %v227_v12, %v225_v11 }
 0x1d7   : > { %229 = vrot.lane.b32.xlu1 %v228_v13, %s629_s28 }
 0x249   : > { %v230_v14 = vpop.permute.xlu1 %229 }
 0x24a   : > { %v231_v15 = vadd.f32 %v230_v14, %v228_v13 }
 0x24c   : > { %232 = vrot.lane.b32.xlu0 %v231_v15, %s630_s29 }
 0x2be   : > { %v233_v16 = vpop.permute.xlu0 %232 }
 0x2bf   : > { %v234_v17 = vadd.f32 %v233_v16, %v231_v15 }
 0x2c1   : > { %461 = vrsqrt.f32 %v234_v17  ;;  %vm239_vm0 = vcmp.eq.f32.partialorder %v234_v17, inf  ;;  %v242_v20 = vand.u32 2147483648, %v234_v17  ;;  %vm241_vm2 = vcmp.eq.f32.partialorder %v234_v17, 0.0 }
 0x2cb   : > { %v462_v18 = vpop.eup %461 }
 0x2cc   : > { %v238_v19 = vmul.f32 %v462_v18, %v234_v17 }
 0x2ce   : > { %v240_v21 = vsel %vm239_vm0, %v234_v17, %v238_v19 }
 0x2cf   : > { %v243_v22 = vsel %vm241_vm2, %v242_v20, %v240_v21 }
 0x2d0   : > { %v245_v23 = vsel %vm244_vm1, %v243_v22, 0.0 }
 0x2d1   : > { %246 = vadd.xlane.f32.xlu1 %v245_v23 }
 0x35e   : > { %v247_v24 = vpop.xlane.xlu1 %246 }
 0x35f   : > { %v248_v25 = vmul.f32 0.0078125, %v247_v24 }
 0x361   : > { %v249_v26 = vadd.f32 1e-06, %v248_v25 }
 0x363   : > { %463 = vrcp.f32 %v249_v26 }
 0x36d   : > { %v464_v29 = vpop.eup %463 }
 0x36e   : > { %v251_v31 = vmul.f32 %v464_v29, %v243_v22 }
 0x370   : > { %v252_v32 = vmul.f32 %v251_v31, %v235_v30 }
 0x372   : > { %v253_v34 = vadd.f32 1.0, %v252_v32 }
 0x374   : > { %v258_v35 = vrot.slane %v253_v34, %v257_v33 }
 0x376   : > { %v260_v37 = vmul.f32 %v258_v35, %v211_v0 }
 0x378   : > { %v267_v38 = vadd.f32 %v384_v36, %v260_v37 }
 0x37a   : > { %268 = vst [vmem:[%s210_s5] sm:$0xff] %v267_v38 }
 0x37b   : > { %564 = shalt.err (!%p561_p7)
}
 0x37c   : > { %s565_s23 = scalar_lea.hbm %s838_s10, 128  ;;  %s569_s20 = scalar_lea.hbm %s885_s3, 256 }
 0x37d   : > { %p566_p10 = scmp.ne.s32.totalorder %s838_s10, %s565_s23  ;;  %p570_p0 = scmp.lt.u32.totalorder %s838_s10, %s885_s3 }
 0x37e   : > { %p571_p11 = scmp.lt.u32.totalorder %s569_s20, %s565_s23  ;;  %p573_p2 = scmp.lt.u32.totalorder %s565_s23, %s838_s10 }
 0x37f   : > { %p567_p13 = pnand %p566_p10, %p772_p6 }
 0x380   : > { %p572_p9 = por %p571_p11, %p570_p0 }
 0x381   : > { %p568_p5 = pneg %p567_p13 }
 0x382   : > { %p574_p1 = por %p573_p2, %p572_p9 }
 0x384   : > { %p575_p4 = pnand %p574_p1, %p568_p5 }
 0x386   : > { %578 = shalt.err (!%p575_p4)
}
 0x387   : > { %399 = dma.vmem_to_hbm [thread:$0]  (%p772_p6), %s840_s6, 128, %s838_s10, %s270_s11  }
 0x388 PF: > { %s295_s28 = sand.u32 1, %s609_s12   ;;  %p900_p8 = scmp.ne.s32.totalorder %s890_s19, 0 }
 0x389   : > { %p901_p12 = scmp.ge.s32.totalorder %s621_s15, 2  ;;  %s296_s29 = scalar_lea.sflag [#allocation4], %s295_s28 }
 0x38b   : > { %p413_p3 = pnand %p901_p12, %p900_p8 }
 0x38d   : > { %604 = dma.done.wait (!%p413_p3), %s296_s29, 128  }
 0x38e   : > { %606 = vsyncadd (!%p413_p3), %s296_s29, 4294967168  ;;  %p17_p7 = scmp.ge.s32.totalorder %s708_s26, 4   ;;  %s902_s12 = smov %s613_s13 }
 0x38f   : > { %s903_s13 = smov %s617_s14  ;;  %s904_s14 = smov %s768_s25 }
 0x390   : > { %s905_s15 = smov %s708_s26  ;;  %19 = sbr.rel (!%p17_p7) target bundleno = 6 (0x6), region = 85 }
 0x397   :  { %301 = vsyncpa [#allocation3], 1 }
 0x398   :  { %303 = vsyncpa [#allocation3 + $0x1], 1 }
 0x399   :  { %304 = vsyncpa [#allocation6], 1 }
 0x39a   :  { %305 = vsyncpa [#allocation4], 1 }
 0x39b   :  { %307 = vsyncpa [#allocation4 + $0x1], 1 }

</bundles_post_ra>
